<compile_context>
chip_gen: v7x
topology: tpu7x:2x2x1
jax: 0.10.0
libtpu: 0.0.40
codegen_flags: <defaults>
</compile_context>

<pallas_src>
import math

import jax
import jax.numpy as jnp
from jax.experimental import pallas as pl
from jax.experimental.pallas import tpu as pltpu


# --------------------------------------------------------------------------
# Trace-time geometry: (6, F, F, 2) normalized equirect sampling grid
# (generate_sampling_grid + cube_to_sphere + sphere_to_equirect).
# --------------------------------------------------------------------------
def _face_grid(face_size: int, fov_degrees: float) -> jnp.ndarray:
    fov_rad = math.radians(fov_degrees)
    t = math.tan(fov_rad / 2.0)
    y = jnp.linspace(-1.0, 1.0, face_size) * t
    x = jnp.linspace(-1.0, 1.0, face_size) * t
    gy, gx = jnp.meshgrid(y, x, indexing="ij")
    ones = jnp.ones_like(gx)
    dirs_per_face = [
        jnp.stack([gx, gy, ones], axis=-1),    # FRONT
        jnp.stack([ones, gy, -gx], axis=-1),   # RIGHT
        jnp.stack([-gx, gy, -ones], axis=-1),  # BACK
        jnp.stack([-ones, gy, gx], axis=-1),   # LEFT
        jnp.stack([gx, ones, -gy], axis=-1),   # TOP
        jnp.stack([gx, -ones, gy], axis=-1),   # BOTTOM
    ]
    dirs = jnp.stack(dirs_per_face, axis=0)                      # (6, F, F, 3)
    dirs = dirs / jnp.linalg.norm(dirs, axis=-1, keepdims=True)
    dx, dy, dz = dirs[..., 0], dirs[..., 1], dirs[..., 2]
    theta = jnp.arctan2(dx, dz)
    phi = jnp.arcsin(jnp.clip(dy, -1.0, 1.0))
    u = (theta / (2.0 * math.pi) + 0.5) * 2.0 - 1.0
    v = phi / (math.pi / 2.0)
    return jnp.stack([u, v], axis=-1).astype(jnp.float32)        # (6, F, F, 2)


def _bilinear_tables(face_size, fov_degrees, H, W):
    """Static per-face tap indices + bilinear corner weights.

    Reproduces grid_sample(mode='bilinear', padding_mode='border',
    align_corners=True) exactly.

    Returns:
      flat0: (6, P) int32 flat index of the top-left tap (y0*W + x0), with
             x0 <= W-2 and y0 <= H-2 so the 2x2 patch is always in bounds.
      w4:    (6, 4, P) float32 weights for taps [tl, tr, bl, br]
             (border-adjusted so clamping the base index is exact).
    """
    grid = _face_grid(face_size, fov_degrees)            # (6, F, F, 2)
    P = face_size * face_size
    u = grid[..., 0].reshape(6, P)
    v = grid[..., 1].reshape(6, P)
    px = jnp.clip((u + 1.0) * 0.5 * (W - 1), 0.0, float(W - 1))
    py = jnp.clip((v + 1.0) * 0.5 * (H - 1), 0.0, float(H - 1))
    x0f = jnp.floor(px)
    y0f = jnp.floor(py)
    wx = px - x0f
    wy = py - y0f
    x0 = x0f.astype(jnp.int32)
    y0 = y0f.astype(jnp.int32)
    x0c = jnp.minimum(x0, W - 2)          # keep x0+1 in-bounds
    y0c = jnp.minimum(y0, H - 2)          # keep y0+1 in-bounds
    wx = wx + (x0 - x0c).astype(jnp.float32)   # shift weight onto the right tap
    wy = wy + (y0 - y0c).astype(jnp.float32)
    flat0 = (y0c * W + x0c).astype(jnp.int32)  # (6, P)
    w4 = jnp.stack(
        [(1.0 - wx) * (1.0 - wy),   # tl : (y0,   x0  )
         wx * (1.0 - wy),           # tr : (y0,   x0+1)
         (1.0 - wx) * wy,           # bl : (y0+1, x0  )
         wx * wy],                  # br : (y0+1, x0+1)
        axis=1).astype(jnp.float32)            # (6, 4, P)
    return flat0, w4


def _choose_pixel_tile(P: int) -> int:
    if P <= 8192:
        return P                      # whole face per tile (last dim == full)
    if P % 128 == 0:
        for tp in (8192, 4096, 2048, 1024, 512, 256, 128):
            if P % tp == 0:
                return tp
    # TODO(synk): non-128-divisible huge faces fall back to one big tile.
    return P


# --------------------------------------------------------------------------
# Pallas kernel: lane-dense bilinear blend for one (batch, face, tile) step.
#   taps_ref : (1, C, 1, 4, TP)  gathered taps [tl, tr, bl, br], input dtype
#   w_ref    : (1, 4, TP)        bilinear corner weights, f32
#   out_ref  : (1, 1, C, TP)     output pixels (pixels on the lane axis)
# --------------------------------------------------------------------------
def _bilinear_blend_kernel(taps_ref, w_ref, out_ref):
    t = taps_ref[0, :, 0, :, :].astype(jnp.float32)      # (C, 4, TP)
    w = w_ref[0, :, :]                                    # (4, TP)
    acc = (t[:, 0, :] * w[0:1, :]
           + t[:, 1, :] * w[1:2, :]
           + t[:, 2, :] * w[2:3, :]
           + t[:, 3, :] * w[3:4, :])                      # (C, TP)
    out_ref[0, 0, :, :] = acc.astype(out_ref.dtype)


# --------------------------------------------------------------------------
# Wrapper: equirect (B, C, H, W) -> cubemap (B, 6, C, F, F)
# --------------------------------------------------------------------------
def equirect_to_cubemap(equirect, face_size, overlap_degrees=2.5):
    B, C, H, W = equirect.shape
    assert H >= 2 and W >= 2, "equirect must be at least 2x2"
    fov = 90.0 + 2.0 * overlap_degrees
    P = face_size * face_size

    flat0, w4 = _bilinear_tables(face_size, fov, H, W)   # (6,P) i32, (6,4,P) f32

    # Gather the four bilinear taps per output pixel with a single
    # static-index XLA gather straight from the NCHW input (no channels-last
    # transpose pass).  Indices are trace-time constants and always in-bounds.
    offs = jnp.array([0, 1, W, W + 1], dtype=jnp.int32)   # tl, tr, bl, br
    idx = flat0[:, None, :] + offs[None, :, None]         # (6, 4, P)
    eq_flat = equirect.reshape(B, C, H * W)
    taps = jnp.take(eq_flat, idx, axis=2, mode="clip")    # (B, C, 6, 4, P)

    TP = _choose_pixel_tile(P)
    n_tiles = P // TP

    # VMEM budget from the actual footprint (double-buffered blocks) + headroom.
    itemsize = jnp.dtype(equirect.dtype).itemsize
    taps_blk = C * 4 * TP * itemsize
    w_blk = 4 * TP * 4
    out_blk = C * TP * itemsize
    vmem_needed = 2 * (taps_blk + w_blk + out_blk)
    vmem_limit = min(max(2 * vmem_needed + (4 << 20), 16 << 20), 64 << 20)

    out = pl.pallas_call(
        _bilinear_blend_kernel,
        out_shape=jax.ShapeDtypeStruct((B, 6, C, P), equirect.dtype),
        grid=(B, 6, n_tiles),
        in_specs=[
            pl.BlockSpec((1, C, 1, 4, TP), lambda b, f, t: (b, 0, f, 0, t)),
            pl.BlockSpec((1, 4, TP), lambda b, f, t: (f, 0, t)),
        ],
        out_specs=pl.BlockSpec((1, 1, C, TP), lambda b, f, t: (b, f, 0, t)),
        compiler_params=pltpu.CompilerParams(
            dimension_semantics=("parallel", "parallel", "parallel"),
            vmem_limit_bytes=int(vmem_limit),
        ),
    )(taps, w4)

    # (B, 6, C, P) -> (B, 6, C, F, F) is a free reshape (no transpose pass).
    return out.reshape(B, 6, C, face_size, face_size)


def cube_projection_forward(x, input_type="equirect", output_type="cubemap",
                            face_size=None, overlap_degrees=2.5):
    """Mirrors CubeProjection.forward (default: equirect -> cubemap)."""
    if input_type == "equirect" and output_type == "cubemap":
        assert face_size is not None
        return equirect_to_cubemap(x, face_size, overlap_degrees)
    elif input_type == output_type:
        return x
    # TODO(synk): cubemap -> equirect path (data-dependent nonzero/scatter
    # loops) has no clean static Pallas formulation here.
    raise NotImplementedError("cubemap -> equirect path not implemented")


# --------------------------------------------------------------------------
# Pure-JAX reference (same grid_sample semantics) for sanity checking
# --------------------------------------------------------------------------
def _reference(equirect, face_size, overlap_degrees=2.5):
    B, C, H, W = equirect.shape
    grid = _face_grid(face_size, 90.0 + 2.0 * overlap_degrees)  # (6, F, F, 2)
    u, v = grid[..., 0], grid[..., 1]
    px = jnp.clip((u + 1.0) * 0.5 * (W - 1), 0.0, W - 1)
    py = jnp.clip((v + 1.0) * 0.5 * (H - 1), 0.0, H - 1)
    x0 = jnp.floor(px).astype(jnp.int32)
    y0 = jnp.floor(py).astype(jnp.int32)
    x1 = jnp.minimum(x0 + 1, W - 1)
    y1 = jnp.minimum(y0 + 1, H - 1)
    wx = px - x0
    wy = py - y0

    def gather(yi, xi):
        return equirect[:, :, yi, xi]   # (B, C, 6, F, F)

    out = (gather(y0, x0) * (1 - wx) * (1 - wy)
           + gather(y0, x1) * wx * (1 - wy)
           + gather(y1, x0) * (1 - wx) * wy
           + gather(y1, x1) * wx * wy)
    return jnp.transpose(out, (0, 2, 1, 3, 4))   # (B, 6, C, F, F)


if __name__ == "__main__":
    key = jax.random.PRNGKey(0)
    B, C, H, W = 2, 4, 16, 32
    face_size = 8
    x = jax.random.normal(key, (B, C, H, W), dtype=jnp.float32)

    cubemap = cube_projection_forward(x, "equirect", "cubemap", face_size=face_size)
    cubemap = jax.block_until_ready(cubemap)

    ref = _reference(x, face_size)
    assert cubemap.shape == (B, 6, C, face_size, face_size), cubemap.shape
    assert jnp.allclose(cubemap, ref, atol=1e-4, rtol=1e-4), "mismatch vs reference"

    print("KERNEL_OK")
</pallas_src>

<mosaic_0001>
module attributes {stable_mosaic.version = 11 : i64} {
  func.func @_bilinear_blend_kernel(%arg0: i32, %arg1: i32, %arg2: i32, %arg3: memref<1x4x1x4x64xf32, #tpu.memory_space<vmem>>, %arg4: memref<1x4x64xf32, #tpu.memory_space<vmem>>, %arg5: memref<1x1x4x64xf32, #tpu.memory_space<vmem>>) attributes {dimension_semantics = [#tpu.dimension_semantics<parallel>, #tpu.dimension_semantics<parallel>, #tpu.dimension_semantics<parallel>], iteration_bounds = array<i64: 2, 6, 1>, scalar_prefetch = 0 : i64, scratch_operands = 0 : i64, tpu.core_type = #tpu.core_type<tc>, window_params = [{transform_indices = @transform_0, window_bounds = array<i64: 1, 4, 1, 4, 64>}, {transform_indices = @transform_1, window_bounds = array<i64: 1, 4, 64>}, {transform_indices = @transform_2, window_bounds = array<i64: 1, 1, 4, 64>}]} {
    %c0 = arith.constant 0 : index
    %c0_0 = arith.constant 0 : index
    %c0_1 = arith.constant 0 : index
    %c0_2 = arith.constant 0 : index
    %c0_3 = arith.constant 0 : index
    %0 = vector.load %arg3[%c0, %c0_0, %c0_1, %c0_2, %c0_3] : memref<1x4x1x4x64xf32, #tpu.memory_space<vmem>>, vector<1x4x1x4x64xf32>
    %1 = vector.shape_cast %0 : vector<1x4x1x4x64xf32> to vector<4x4x64xf32>
    %c0_4 = arith.constant 0 : index
    %c0_5 = arith.constant 0 : index
    %c0_6 = arith.constant 0 : index
    %2 = vector.load %arg4[%c0_4, %c0_5, %c0_6] : memref<1x4x64xf32, #tpu.memory_space<vmem>>, vector<1x4x64xf32>
    %3 = vector.shape_cast %2 : vector<1x4x64xf32> to vector<4x64xf32>
    %4 = vector.extract_strided_slice %1 {offsets = [0, 0, 0], sizes = [4, 1, 64], strides = [1, 1, 1]} : vector<4x4x64xf32> to vector<4x1x64xf32>
    %5 = vector.shape_cast %4 : vector<4x1x64xf32> to vector<4x64xf32>
    %6 = vector.extract_strided_slice %3 {offsets = [0, 0], sizes = [1, 64], strides = [1, 1]} : vector<4x64xf32> to vector<1x64xf32>
    %7 = vector.broadcast %6 : vector<1x64xf32> to vector<4x64xf32>
    %8 = arith.mulf %5, %7 : vector<4x64xf32>
    %9 = vector.extract_strided_slice %1 {offsets = [0, 1, 0], sizes = [4, 1, 64], strides = [1, 1, 1]} : vector<4x4x64xf32> to vector<4x1x64xf32>
    %10 = vector.shape_cast %9 : vector<4x1x64xf32> to vector<4x64xf32>
    %11 = vector.extract_strided_slice %3 {offsets = [1, 0], sizes = [1, 64], strides = [1, 1]} : vector<4x64xf32> to vector<1x64xf32>
    %12 = vector.broadcast %11 : vector<1x64xf32> to vector<4x64xf32>
    %13 = arith.mulf %10, %12 : vector<4x64xf32>
    %14 = arith.addf %8, %13 : vector<4x64xf32>
    %15 = vector.extract_strided_slice %1 {offsets = [0, 2, 0], sizes = [4, 1, 64], strides = [1, 1, 1]} : vector<4x4x64xf32> to vector<4x1x64xf32>
    %16 = vector.shape_cast %15 : vector<4x1x64xf32> to vector<4x64xf32>
    %17 = vector.extract_strided_slice %3 {offsets = [2, 0], sizes = [1, 64], strides = [1, 1]} : vector<4x64xf32> to vector<1x64xf32>
    %18 = vector.broadcast %17 : vector<1x64xf32> to vector<4x64xf32>
    %19 = arith.mulf %16, %18 : vector<4x64xf32>
    %20 = arith.addf %14, %19 : vector<4x64xf32>
    %21 = vector.extract_strided_slice %1 {offsets = [0, 3, 0], sizes = [4, 1, 64], strides = [1, 1, 1]} : vector<4x4x64xf32> to vector<4x1x64xf32>
    %22 = vector.shape_cast %21 : vector<4x1x64xf32> to vector<4x64xf32>
    %23 = vector.extract_strided_slice %3 {offsets = [3, 0], sizes = [1, 64], strides = [1, 1]} : vector<4x64xf32> to vector<1x64xf32>
    %24 = vector.broadcast %23 : vector<1x64xf32> to vector<4x64xf32>
    %25 = arith.mulf %22, %24 : vector<4x64xf32>
    %26 = arith.addf %20, %25 : vector<4x64xf32>
    %c0_7 = arith.constant 0 : index
    %c0_8 = arith.constant 0 : index
    %c0_9 = arith.constant 0 : index
    %c0_10 = arith.constant 0 : index
    %27 = vector.load %arg5[%c0_7, %c0_8, %c0_9, %c0_10] : memref<1x1x4x64xf32, #tpu.memory_space<vmem>>, vector<1x1x4x64xf32>
    %28 = vector.shape_cast %27 : vector<1x1x4x64xf32> to vector<4x64xf32>
    %29 = vector.shape_cast %26 : vector<4x64xf32> to vector<1x1x4x64xf32>
    tpu.vector_store %arg5[%c0_7, %c0_8, %c0_9, %c0_10], %29 {strides = array<i32>} : memref<1x1x4x64xf32, #tpu.memory_space<vmem>>, vector<1x1x4x64xf32>,
    return
  }
  func.func @transform_0(%arg0: i32, %arg1: i32, %arg2: i32) -> (i32, i32, i32, i32, i32) {
    %c0_i32 = arith.constant 0 : i32
    %c0_i32_0 = arith.constant 0 : i32
    %c0_i32_1 = arith.constant 0 : i32
    return %arg0, %c0_i32, %arg1, %c0_i32_0, %arg2 : i32, i32, i32, i32, i32
  }
  func.func @transform_1(%arg0: i32, %arg1: i32, %arg2: i32) -> (i32, i32, i32) {
    %c0_i32 = arith.constant 0 : i32
    %c0_i32_0 = arith.constant 0 : i32
    return %arg1, %c0_i32, %arg2 : i32, i32, i32
  }
  func.func @transform_2(%arg0: i32, %arg1: i32, %arg2: i32) -> (i32, i32, i32, i32) {
    %c0_i32 = arith.constant 0 : i32
    %c0_i32_0 = arith.constant 0 : i32
    return %arg0, %arg1, %c0_i32, %arg2 : i32, i32, i32, i32
  }
}

</mosaic_0001>

<bundles_post_ra>
// kernel: tpu_custom_call.1
= control target key start
LH: loop header
LB: loop body
LE: loop exit
PB: predicated region body
PF: predicated region fallthrough
CT: control target
= control target key end

     0   :  { %s1125_s0 = inlined_call_operand.hbm [shape: f32[2,4,6,4,64], index: 0, kind: input, shape index: {}]   ;;  %s1126_s1 = inlined_call_operand.hbm [shape: f32[6,4,64], index: 1, kind: input, shape index: {}]   ;;  %s1127_s2 = inlined_call_operand.hbm [shape: f32[2,6,4,64], index: 2, kind: output, shape index: {}]  }
   0x1   :  { %1135 = sst [smem:[#allocation12_spill]] %s1125_s0 }
   0x2   :  { %7 = vsyncpa [#allocation3], 0 }
   0x3   :  { %9 = vsyncpa [#allocation3 + $0x1], 0 }
   0x4   :  { %10 = vsyncpa [#allocation6], 0 }
   0x5   :  { %12 = vsyncpa [#allocation6 + $0x1], 0 }
   0x6   :  { %13 = vsyncpa [#allocation4], 0 }
   0x7   :  { %15 = vsyncpa [#allocation4 + $0x1], 0  ;;  %s800_s9 = smov 0   ;;  %s802_s10 = smov 0  }
   0x8   :  { %s804_s11 = smov 0   ;;  %s806_s12 = smov 0  }
   0x9   :  { %s808_s13 = smov 0   ;;  %s810_s14 = smov 0  }
   0xa   :  { %s812_s15 = smov 0   ;;  %s814_s16 = smov 0  }
   0xb   :  { %s816_s17 = smov 0   ;;  %s818_s18 = smov 0  }
   0xc   :  { %s820_s19 = smov 0  }
   0xd LB: > { %s36_s20 = sadd.s32 1, %s769_s17  ;;  %s40_s21 = sadd.s32 1, %s773_s18  ;;  %s777_s19 = sphi %s820_s19, %s21_s19   ;;  %s773_s18 = sphi %s818_s18, %s1165_s18   ;;  %s769_s17 = sphi %s816_s17, %s1164_s17   ;;  %s765_s16 = sphi %s814_s16, %s1163_s16   ;;  %s761_s15 = sphi %s812_s15, %s1162_s15   ;;  %s757_s14 = sphi %s810_s14, %s1161_s14   ;;  %s753_s13 = sphi %s808_s13, %s1160_s13   ;;  %s749_s12 = sphi %s806_s12, %s1159_s12   ;;  %s745_s11 = sphi %s804_s11, %s1158_s11   ;;  %s741_s10 = sphi %s802_s10, %s1157_s10   ;;  %s737_s9 = sphi %s800_s9, %s1156_s9  }
   0xe   : > { %p859_p0 = scmp.ge.s32.totalorder %s36_s20, 6  ;;  %s51_s23 = sadd.s32 1, %s757_s14 }
   0xf   : > { %p1129_p1 = scmp.ne.s32.totalorder %s757_s14, %s753_s13  ;;  %p1130_p2 = scmp.eq.s32.totalorder %s777_s19, 0 }
  0x10   : > { %s1167_s21 = smov (!%p859_p0, %s40_s21), %s773_s18  ;;  %p1128_p4 = scmp.lt.s32.totalorder %s777_s19, 12 }
  0x11   : > { %p60_p3 = por %p1130_p2, %p1129_p1  ;;  %s146_s24 = sand.u32 1, %s757_s14  }
  0x12   : > { %s467_s25 = sshll.u32 %s146_s24, 4  ;;  %s479_s26 = smul.u32 24, %s773_s18 }
  0x13   : > { %s150_s27 = scalar_lea.vmem [#allocation2], %s467_s25  ;;  %p882_p5 = pnand %p1128_p4, %p60_p3 }
  0x14   : > { %s159_s28 = sshll.u32 %s150_s27, 4  ;;  %s156_s30 = sadd.s32 %s769_s17, %s479_s26  ;;  %s887_s28 = int_to_ptr.vmem [resolvable:$true] %s159_s28 }
  0x15   : > { %s468_s3 = sshll.u32 %s156_s30, 6  ;;  %s1138_s0 = sld [smem:[#allocation12_spill]] }
  0x16   : > { %s894_s7 = scalar_lea.sflag [#allocation3], %s146_s24  ;;  %p593_p7 = pneg %p882_p5 }
  0x1b   : > { %s892_s6 = scalar_lea.hbm %s1138_s0, %s468_s3  ;;  %s596_s27 = scalar_lea.hbm %s1138_s0, 3072 }
  0x1c   : > { %s591_s8 = scalar_lea.hbm %s892_s6, 256  ;;  %p597_p10 = scmp.lt.u32.totalorder %s892_s6, %s1138_s0 }
  0x1d   : > { %p592_p6 = scmp.ne.s32.totalorder %s892_s6, %s591_s8  ;;  %p598_p11 = scmp.lt.u32.totalorder %s596_s27, %s591_s8 }
  0x1e   : > { %p600_p13 = scmp.lt.u32.totalorder %s591_s8, %s892_s6 }
  0x1f   : > { %p594_p8 = pnand %p593_p7, %p592_p6  ;;  %p599_p12 = por %p598_p11, %p597_p10 }
  0x21   : > { %p595_p9 = pneg %p594_p8  ;;  %p601_p3 = por %p600_p13, %p599_p12 }
  0x23   : > { %p602_p4 = pnand %p601_p3, %p595_p9 }
  0x25   : > { %605 = shalt.err (!%p602_p4)
}
  0x26   : > { %s606_s24 = scalar_lea.vmem %s887_s28, 256  ;;  %s779_s4 = smov [#allocation2]  }
  0x27   : > { %p607_p6 = scmp.ne.s32.totalorder %s887_s28, %s606_s24  ;;  %s611_s5 = sshll.u32 %s779_s4, 4  ;;  %s612_s5 = int_to_ptr.vmem [resolvable:$false] %s611_s5 }
  0x28   : > { %s613_s25 = scalar_lea.vmem %s612_s5, 512  ;;  %p614_p2 = scmp.lt.s32.totalorder %s887_s28, %s612_s5 }
  0x29   : > { %p609_p8 = pnand %p607_p6, %p593_p7  ;;  %p615_p10 = scmp.lt.s32.totalorder %s613_s25, %s606_s24 }
  0x2b   : > { %p610_p1 = pneg %p609_p8  ;;  %p616_p11 = por %p615_p10, %p614_p2 }
  0x2d   : > { %p617_p12 = pnand %p616_p11, %p610_p1 }
  0x2f   : > { %620 = shalt.err (!%p617_p12)
}
  0x30   : > { %s780_s8 = smov 384   ;;  %s781_s26 = smov 64  }
  0x31   : > { %s782_s27 = smov 4   ;;  %p471_p1 = scmp.ge.s32.totalorder %s777_s19, 1 }
  0x32   : > { %490 = dma.hbm_to_vmem [thread:$0]  (!%p882_p5), %s892_s6, 256, %s887_s28, %s894_s7, %s780_s8, %s781_s26, %s782_s27  }
  0x33   : > { %p186_p2 = scmp.lt.s32.totalorder %s777_s19, 13  ;;  %s463_s3 = sadd.s32 4294967295, %s777_s19  }
  0x34   : > { %s464_s24 = sadd.s32 4294967294, %s777_s19   ;;  %p42_p7 = scmp.ge.s32.totalorder %s1167_s21, 2 }
  0x35   : > { %p924_p4 = pnand %p471_p1, %p186_p2  ;;  %s1169_s20 = smov (%p859_p0, %s36_s20), 0 }
  0x36   : > { %s1171_s21 = smov (%p42_p7, %s1167_s21), 0  ;;  %s45_s28 = ssub.s32 %s769_s17, %s1169_s20 }
  0x37   : > { %1140 = sst [smem:[#allocation11_spill]] %s1171_s21  ;;  %p64_p5 = scmp.ne.s32.totalorder %s753_s13, %s749_s12 }
  0x38   : > { %s44_s29 = ssub.s32 %s773_s18, %s1171_s21  ;;  %p946_p9 = scmp.eq.s32.totalorder %s463_s3, 0 }
  0x39   : > { %s46_s22 = sor.u32 %s45_s28, %s44_s29  ;;  %p77_p0 = scmp.eq.s32.totalorder %s45_s28, 0 }
  0x3a   : > { %p49_p13 = scmp.eq.s32.totalorder %s46_s22, 0  ;;  %p955_p3 = por %p946_p9, %p64_p5 }
  0x3b   : > { %s79_s4 = sadd.s32 1, %s745_s11  ;;  %p86_p6 = scmp.ne.s32.totalorder %s745_s11, %s741_s10 }
  0x3c   : > { %s1142_s7 = scalar_select %p955_p3, 1, 0 }
  0x3d   : > { %s965_s5 = scalar_select %p49_p13, %s757_s14, %s51_s23  }
  0x3e   : > { %s968_s25 = scalar_select %p77_p0, %s745_s11, %s79_s4  }
  0x3f   : > { %p1143_p8 = scmp.eq.s32.totalorder %s777_s19, 0  ;;  %p92_p11 = scmp.ne.s32.totalorder %s741_s10, %s737_s9 }
  0x40   : > { %p120_p12 = scmp.eq.s32.totalorder %s463_s3, 11  ;;  %p126_p1 = scmp.eq.s32.totalorder %s464_s24, 11 }
  0x41   : > { %p972_p10 = por %p86_p6, %p1143_p8  ;;  %p980_p2 = por %p92_p11, %p946_p9 }
  0x42   : > { %s169_s27 = sand.u32 1, %s745_s11   ;;  %p1146_p7 = scmp.ne.s32.totalorder %s757_s14, %s753_s13 }
  0x43   : > { %s1145_s26 = scalar_select %p980_p2, 1, 0 }
  0x44   : > { %p988_p13 = por %p120_p12, %p1146_p7  ;;  %p995_p0 = por %p126_p1, %p64_p5 }
  0x45   : > { %s469_s29 = sshll.u32 %s169_s27, 2  ;;  %s470_s9 = sshll.u32 %s769_s17, 6 }
  0x46   : > { %s1147_s23 = scalar_select %p988_p13, 1, 0 }
  0x47   : > { %s1148_s28 = scalar_select %p995_p0, 1, 0 }
  0x48   : > { %s1003_s6 = scalar_lea.hbm %s1126_s1, %s470_s9  ;;  %s173_s22 = scalar_lea.vmem [#allocation5], %s469_s29 }
  0x49   : > { %s181_s4 = sshll.u32 %s173_s22, 4  ;;  %p1149_p5 = scmp.lt.s32.totalorder %s777_s19, 12  ;;  %s1005_s4 = int_to_ptr.vmem [resolvable:$true] %s181_s4 }
  0x4a   : > { %s170_s21 = scalar_lea.sflag [#allocation6], %s169_s27  ;;  %s621_s3 = scalar_lea.hbm %s1003_s6, 64 }
  0x4b   : > { %p1011_p9 = pnand %p1149_p5, %p972_p10  ;;  %p622_p6 = scmp.ne.s32.totalorder %s1003_s6, %s621_s3 }
  0x4c   : > { %s626_s8 = scalar_lea.hbm %s1126_s1, 384  ;;  %p627_p10 = scmp.lt.u32.totalorder %s1003_s6, %s1126_s1 }
  0x4d   : > { %p623_p8 = pneg %p1011_p9  ;;  %p628_p1 = scmp.lt.u32.totalorder %s626_s8, %s621_s3 }
  0x4e   : > { %p630_p5 = scmp.lt.u32.totalorder %s621_s3, %s1003_s6 }
  0x4f   : > { %p624_p11 = pnand %p623_p8, %p622_p6  ;;  %p629_p7 = por %p628_p1, %p627_p10 }
  0x51   : > { %p625_p12 = pneg %p624_p11  ;;  %p631_p0 = por %p630_p5, %p629_p7 }
  0x53   : > { %p632_p13 = pnand %p631_p0, %p625_p12 }
  0x55   : > { %635 = shalt.err (!%p632_p13)
}
  0x56   : > { %s636_s27 = scalar_lea.vmem %s1005_s4, 64  ;;  %s783_s29 = smov [#allocation5]  }
  0x57   : > { %p637_p6 = scmp.ne.s32.totalorder %s1005_s4, %s636_s27  ;;  %s641_s9 = sshll.u32 %s783_s29, 4  ;;  %s642_s9 = int_to_ptr.vmem [resolvable:$false] %s641_s9 }
  0x58   : > { %s643_s24 = scalar_lea.vmem %s642_s9, 128  ;;  %p644_p3 = scmp.lt.s32.totalorder %s1005_s4, %s642_s9 }
  0x59   : > { %p639_p11 = pnand %p637_p6, %p623_p8  ;;  %p645_p10 = scmp.lt.s32.totalorder %s643_s24, %s636_s27 }
  0x5b   : > { %p640_p2 = pneg %p639_p11  ;;  %p646_p1 = por %p645_p10, %p644_p3 }
  0x5d   : > { %p647_p7 = pnand %p646_p1, %p640_p2 }
  0x5f   : > { %650 = shalt.err (!%p647_p7)
}
  0x60   : > { %493 = dma.hbm_to_vmem [thread:$0]  (!%p1011_p9), %s1003_s6, 64, %s1005_s4, %s170_s21  }
  0x61   : > { %190 = sbr.rel (%p924_p4) target bundleno = 148 (0x94), region = 28  ;;  %s1043_s3 = sand.u32 (!%p924_p4), 1, %s753_s13  }
  0x62   : > { %s472_s8 = sshll.u32 (!%p924_p4), %s1043_s3, 4  ;;  %s193_s22 = scalar_lea.sflag (!%p924_p4), [#allocation3], %s1043_s3 }
  0x63   : > { %s196_s27 = scalar_lea.vmem (!%p924_p4), [#allocation2], %s472_s8  ;;  %p1151_p3 = scmp.ne.s32.totalorder (!%p924_p4), %s1142_s7, 0 }
  0x68   : > { %724 = dma.done.wait (%p1151_p3), %s193_s22, 256  }
  0x69   : > { %726 = vsyncadd (%p1151_p3), %s193_s22, 4294967040  ;;  %s201_s0 = sand.u32 1, %s741_s10   ;;  %p1152_p4 = scmp.ne.s32.totalorder %s1145_s26, 0 }
  0x6a   : > { %s473_s21 = sshll.u32 %s201_s0, 2  ;;  %s202_s30 = scalar_lea.sflag [#allocation6], %s201_s0 }
  0x6b   : > { %s205_s6 = scalar_lea.vmem [#allocation5], %s473_s21 }
  0x6c   : > { %728 = dma.done.wait (%p1152_p4), %s202_s30, 64  }
  0x6d   : > { %730 = vsyncadd (%p1152_p4), %s202_s30, 4294967232  ;;  %v236_v0 = vlaneseq  ;;  %v231_v6 = vld [vmem:[%s196_s27] sm:$0xf]  ;;  %v232_v8 = vld [vmem:[%s196_s27 + $0x4] sm:$0xf]  ;;  %s480_s7 = smul.u32 6, %s765_s16 }
  0x6e   : > { %v235_v7 = vld [vmem:[%s205_s6] sm:$0xf]  ;;  %v233_v9 = vld [vmem:[%s196_s27 + $0x8] sm:$0xf]  ;;  %v234_v10 = vld [vmem:[%s196_s27 + $0xc] sm:$0xf] }
  0x6f   : > { %v237_v1 = vshrl.u32 %v236_v0, 7  ;;  %s474_s26 = sshll.u32 %s1043_s3, 2  ;;  %s345_s4 = sadd.s32 %s761_s15, %s480_s7  ;;  %vm321_vm0 = vcmask 1041409   ;;  %vm324_vm1 = vcmask 1042434   ;;  %vm327_vm2 = vcmask 1043459  }
  0x70   : > { %s230_s16 = scalar_lea.vmem [#allocation7], %s474_s26  ;;  %s476_s9 = sshll.u32 %s345_s4, 6  ;;  %vm330_vm3 = vcmask 519168  }
  0x71   : > { %v238_v2 = vsub.s32 0, %v237_v1  ;;  %v246_v3 = vsub.s32 1, %v237_v1  ;;  %v270_v4 = vsub.s32 2, %v237_v1  ;;  %v294_v5 = vsub.s32 3, %v237_v1  ;;  %s349_s29 = sshll.u32 %s230_s16, 4  ;;  %s1064_s8 = scalar_lea.hbm %s1127_s2, %s476_s9  ;;  %s1059_s29 = int_to_ptr.vmem [resolvable:$true] %s349_s29 }
  0x72   : > { %s333_s22 = scalar_lea.sflag [#allocation4], %s1043_s3  ;;  %s651_s27 = scalar_lea.vmem %s1059_s29, 64 }
  0x73   : > { %v239_v11 = vrot.slane %v235_v7, %v238_v2  ;;  %v247_v12 = vrot.slane %v235_v7, %v246_v3  ;;  %v271_v13 = vrot.slane %v235_v7, %v270_v4  ;;  %v295_v14 = vrot.slane %v235_v7, %v294_v5  ;;  %p652_p2 = scmp.ne.s32.totalorder %s1059_s29, %s651_s27  ;;  %p1153_p13 = scmp.ne.s32.totalorder %s1147_s23, 0 }
  0x74   : > { %s784_s0 = smov [#allocation7]  }
  0x75   : > { %v240_v15 = vmul.f32 %v239_v11, %v231_v6  ;;  %v241_v16 = vmul.f32 %v239_v11, %v232_v8  ;;  %v242_v17 = vmul.f32 %v239_v11, %v233_v9  ;;  %v243_v18 = vmul.f32 %v239_v11, %v234_v10  ;;  %p653_p0 = pnand %p652_p2, %p1153_p13  ;;  %s655_s21 = sshll.u32 %s784_s0, 4  ;;  %s656_s21 = int_to_ptr.vmem [resolvable:$false] %s655_s21 }
  0x76   : > { %v248_v19 = vmul.f32 %v247_v12, %v231_v6  ;;  %v249_v20 = vmul.f32 %v247_v12, %v232_v8  ;;  %v250_v21 = vmul.f32 %v247_v12, %v233_v9  ;;  %v251_v22 = vmul.f32 %v247_v12, %v234_v10  ;;  %s657_s30 = scalar_lea.vmem %s656_s21, 128  ;;  %p658_p8 = scmp.lt.s32.totalorder %s1059_s29, %s656_s21 }
  0x77   : > { %v272_v23 = vmul.f32 %v271_v13, %v231_v6  ;;  %v273_v24 = vmul.f32 %v271_v13, %v232_v8  ;;  %v274_v25 = vmul.f32 %v271_v13, %v233_v9  ;;  %v275_v26 = vmul.f32 %v271_v13, %v234_v10  ;;  %p654_p9 = pneg %p653_p0  ;;  %p659_p12 = scmp.lt.s32.totalorder %s657_s30, %s651_s27 }
  0x78   : > { %v256_v27 = vrot.slane %v248_v19, 1  ;;  %v257_v28 = vrot.slane %v249_v20, 1  ;;  %v258_v29 = vrot.slane %v250_v21, 1  ;;  %v259_v30 = vrot.slane %v251_v22, 1 }
  0x79   : > { %v280_v31 = vrot.slane %v272_v23, 2  ;;  %v281_v32 = vrot.slane %v273_v24, 2  ;;  %v282_v33 = vrot.slane %v274_v25, 2  ;;  %v283_v34 = vrot.slane %v275_v26, 2  ;;  %p660_p5 = por %p659_p12, %p658_p8 }
  0x7a   : > { %v264_v35 = vadd.f32 %v256_v27, %v240_v15  ;;  %v265_v36 = vadd.f32 %v257_v28, %v241_v16  ;;  %v266_v37 = vadd.f32 %v258_v29, %v242_v17  ;;  %v267_v38 = vadd.f32 %v259_v30, %v243_v18 }
  0x7b   : > { %v296_v39 = vmul.f32 %v295_v14, %v231_v6  ;;  %v297_v40 = vmul.f32 %v295_v14, %v232_v8  ;;  %v298_v41 = vmul.f32 %v295_v14, %v233_v9  ;;  %v299_v42 = vmul.f32 %v295_v14, %v234_v10  ;;  %p661_p6 = pnand %p660_p5, %p654_p9 }
  0x7c   : > { %v288_v43 = vadd.f32 %v280_v31, %v264_v35  ;;  %v289_v44 = vadd.f32 %v281_v32, %v265_v36  ;;  %v290_v45 = vadd.f32 %v282_v33, %v266_v37  ;;  %v291_v46 = vadd.f32 %v283_v34, %v267_v38 }
  0x7d   : > { %v304_v47 = vrot.slane %v296_v39, 3  ;;  %v305_v48 = vrot.slane %v297_v40, 3  ;;  %v306_v49 = vrot.slane %v298_v41, 3  ;;  %v307_v50 = vrot.slane %v299_v42, 3 }
  0x7f   : > { %v312_v51 = vadd.f32 %v304_v47, %v288_v43  ;;  %v313_v52 = vadd.f32 %v305_v48, %v289_v44  ;;  %v314_v53 = vadd.f32 %v306_v49, %v290_v45  ;;  %v315_v54 = vadd.f32 %v307_v50, %v291_v46 }
  0x81   : > { %v320_v55 = vrot.slane %v313_v52, 7  ;;  %v323_v56 = vrot.slane %v314_v53, 6  ;;  %v326_v57 = vrot.slane %v315_v54, 5 }
  0x83   : > { %v322_v58 = vsel %vm321_vm0, %v320_v55, %v312_v51 }
  0x84   : > { %v325_v59 = vsel %vm324_vm1, %v323_v56, %v322_v58 }
  0x85   : > { %v328_v60 = vsel %vm327_vm2, %v326_v57, %v325_v59 }
  0x86   : > { %331 = vst.msk [vmem:[%s230_s16] sm:$0xf] %vm330_vm3, %v328_v60 }
  0x87   : > { %664 = shalt.err (!%p661_p6)
}
  0x88   : > { %s665_s3 = scalar_lea.hbm %s1064_s8, 64  ;;  %s669_s26 = scalar_lea.hbm %s1127_s2, 768 }
  0x89   : > { %p666_p11 = scmp.ne.s32.totalorder %s1064_s8, %s665_s3  ;;  %p670_p7 = scmp.lt.u32.totalorder %s1064_s8, %s1127_s2 }
  0x8a   : > { %p671_p3 = scmp.lt.u32.totalorder %s669_s26, %s665_s3  ;;  %p673_p2 = scmp.lt.u32.totalorder %s665_s3, %s1064_s8 }
  0x8b   : > { %p667_p10 = pnand %p666_p11, %p1153_p13 }
  0x8c   : > { %p672_p4 = por %p671_p3, %p670_p7 }
  0x8d   : > { %p668_p1 = pneg %p667_p10 }
  0x8e   : > { %p674_p0 = por %p673_p2, %p672_p4 }
  0x90   : > { %p675_p9 = pnand %p674_p0, %p668_p1 }
  0x92   : > { %678 = shalt.err (!%p675_p9)
}
  0x93   : > { %485 = dma.vmem_to_hbm [thread:$0]  (%p1153_p13), %s1059_s29, 64, %s1064_s8, %s333_s22  }
  0x94 PF: > { %p499_p8 = scmp.ge.s32.totalorder %s777_s19, 2  ;;  %s361_s9 = sand.u32 1, %s749_s12  }
  0x95   : > { %p1154_p12 = scmp.ne.s32.totalorder %s1148_s28, 0  ;;  %s362_s15 = scalar_lea.sflag [#allocation4], %s361_s9 }
  0x97   : > { %p495_p5 = pnand %p499_p8, %p1154_p12 }
  0x99   : > { %732 = dma.done.wait (!%p495_p5), %s362_s15, 64  }
  0x9a   : > { %734 = vsyncadd (!%p495_p5), %s362_s15, 4294967232  ;;  %s21_s19 = sadd.s32 1, %s777_s19   ;;  %s1155_s23 = sld [smem:[#allocation11_spill]] }
  0x9b   : > { %p18_p6 = scmp.ge.s32.totalorder %s21_s19, 14   ;;  %s1156_s9 = smov %s741_s10 }
  0x9c   : > { %s1157_s10 = smov %s745_s11  ;;  %s1158_s11 = smov %s968_s25 }
  0x9d   : > { %s1159_s12 = smov %s753_s13  ;;  %s1160_s13 = smov %s757_s14 }
  0x9e   : > { %s1161_s14 = smov %s965_s5  ;;  %s1162_s15 = smov %s769_s17 }
  0x9f   : > { %s1163_s16 = smov %s773_s18  ;;  %s1164_s17 = smov %s1169_s20 }
  0xa0   : > { %s1165_s18 = smov %s1155_s23  ;;  %20 = sbr.rel (!%p18_p6) target bundleno = 13 (0xd), region = 86 }
  0xa7   :  { %367 = vsyncpa [#allocation3], 1 }
  0xa8   :  { %369 = vsyncpa [#allocation3 + $0x1], 1 }
  0xa9   :  { %370 = vsyncpa [#allocation6], 1 }
  0xaa   :  { %372 = vsyncpa [#allocation6 + $0x1], 1 }
  0xab   :  { %373 = vsyncpa [#allocation4], 1 }
  0xac   :  { %375 = vsyncpa [#allocation4 + $0x1], 1 }

</bundles_post_ra>
